<compile_context>
chip_gen: v6e
topology: v6e:2x2x1
jax: 0.10.0
libtpu: 0.0.40
codegen_flags: <defaults>
</compile_context>

<pallas_src>
import functools
import math

import jax
import jax.numpy as jnp
from jax.experimental import pallas as pl
from jax.experimental.pallas import tpu as pltpu

_SQRT_2_OVER_PI = math.sqrt(2.0 / math.pi)


def _gelu_tanh_f32(x):
    """GELU, tanh approximation (matches the PyTorch GELU module), computed in f32."""
    x = x.astype(jnp.float32)
    return 0.5 * x * (1.0 + jnp.tanh(_SQRT_2_OVER_PI * (x + 0.044715 * x * x * x)))


# ------------------------- Kernel A: full weight residency (small/medium d) -------------------------
def _ffn_kernel_resident(x_ref, w1_ref, b1_ref, w2_ref, b2_ref, o_ref, *, mxu_dtype):
    x = x_ref[...].astype(mxu_dtype)                                       # (tm, d)  bf16 MXU operand
    hid = jnp.dot(x, w1_ref[...], preferred_element_type=jnp.float32)      # (tm, h)  f32 accumulate
    hid = hid + b1_ref[...]
    hid = _gelu_tanh_f32(hid)                                              # f32 elementwise (VPU/EUP)
    y = jnp.dot(hid.astype(mxu_dtype), w2_ref[...],
                preferred_element_type=jnp.float32) + b2_ref[...]          # (tm, d)
    o_ref[...] = y.astype(o_ref.dtype)


# ------------------------- Kernel B: hidden-dim tiled accumulator (large d / v7x) -------------------------
def _ffn_kernel_htiled(x_ref, w1_ref, b1_ref, w2_ref, b2_ref, o_ref, acc_ref, *, mxu_dtype):
    k = pl.program_id(1)

    @pl.when(k == 0)
    def _init():
        acc_ref[...] = jnp.zeros_like(acc_ref)

    x = x_ref[...].astype(mxu_dtype)                                       # (tm, d)
    hid = jnp.dot(x, w1_ref[...], preferred_element_type=jnp.float32)      # (tm, th)
    hid = _gelu_tanh_f32(hid + b1_ref[...])
    acc_ref[...] += jnp.dot(hid.astype(mxu_dtype), w2_ref[...],
                            preferred_element_type=jnp.float32)            # partial fc2 sum over h

    @pl.when(k == pl.num_programs(1) - 1)
    def _finalize():
        o_ref[...] = (acc_ref[...] + b2_ref[...]).astype(o_ref.dtype)


# ------------------------- Wrapper helpers -------------------------
def _round_up(n, m):
    return ((n + m - 1) // m) * m


def _vmem_limit_bytes():
    try:
        cap = int(pltpu.get_tpu_info().vmem_capacity_bytes)
    except Exception:  # pragma: no cover - conservative default (v7x per-TC VMEM)
        cap = 64 << 20
    return int(min(cap * 3 // 4, 112 << 20))


def _pick_tm(M):
    unit = 8  # x / out stay f32 in HBM (8-sublane tiling); only the MXU operands are bf16
    if M <= unit:
        return unit
    # At least two "parallel" row tiles so v7x megacore can shard the batch axis; larger tiles
    # (up to 512) amortize the ~0.35us per-grid-step overhead as M grows.
    return min(512, _round_up(pl.cdiv(M, 2), unit))


def _pick_th(h):
    for th in (2048, 1024, 512, 256, 128):
        if h % th == 0:
            return th
    return None


def _resident_call(x2, w1, b1, w2, b2, *, tm, mxu_dtype, vmem_limit, single_buffer_weights):
    M, d = x2.shape
    h = w1.shape[1]
    invariant = dict(pipeline_mode=pl.Buffered(1)) if single_buffer_weights else {}
    return pl.pallas_call(
        functools.partial(_ffn_kernel_resident, mxu_dtype=mxu_dtype),
        out_shape=jax.ShapeDtypeStruct((M, d), x2.dtype),
        grid=(pl.cdiv(M, tm),),
        in_specs=[
            pl.BlockSpec((tm, d), lambda i: (i, 0)),              # activations: tiled along M
            pl.BlockSpec((d, h), lambda i: (0, 0), **invariant),  # W1: resident, single-buffered
            pl.BlockSpec((1, h), lambda i: (0, 0), **invariant),  # b1
            pl.BlockSpec((h, d), lambda i: (0, 0), **invariant),  # W2
            pl.BlockSpec((1, d), lambda i: (0, 0), **invariant),  # b2
        ],
        out_specs=pl.BlockSpec((tm, d), lambda i: (i, 0)),
        compiler_params=pltpu.CompilerParams(
            dimension_semantics=("parallel",),
            vmem_limit_bytes=vmem_limit,
        ),
    )(x2, w1, b1, w2, b2)


def _htiled_call(x2, w1, b1, w2, b2, *, tm, th, mxu_dtype, vmem_limit, single_buffer_weights):
    M, d = x2.shape
    h = w1.shape[1]
    invariant = dict(pipeline_mode=pl.Buffered(1)) if single_buffer_weights else {}
    return pl.pallas_call(
        functools.partial(_ffn_kernel_htiled, mxu_dtype=mxu_dtype),
        out_shape=jax.ShapeDtypeStruct((M, d), x2.dtype),
        grid=(pl.cdiv(M, tm), h // th),                            # reduction (h) axis LAST
        in_specs=[
            pl.BlockSpec((tm, d), lambda i, k: (i, 0)),            # x: constant over k
            pl.BlockSpec((d, th), lambda i, k: (0, k)),            # W1: tiled along h
            pl.BlockSpec((1, th), lambda i, k: (0, k)),            # b1: tiled along h
            pl.BlockSpec((th, d), lambda i, k: (k, 0)),            # W2: tiled along h
            pl.BlockSpec((1, d), lambda i, k: (0, 0), **invariant),  # b2: invariant
        ],
        out_specs=pl.BlockSpec((tm, d), lambda i, k: (i, 0)),      # output resident across k
        scratch_shapes=[pltpu.VMEM((tm, d), jnp.float32)],         # f32 accumulator
        compiler_params=pltpu.CompilerParams(
            dimension_semantics=("parallel", "arbitrary"),
            vmem_limit_bytes=vmem_limit,
        ),
    )(x2, w1, b1, w2, b2)


def feed_forward(x, w1, b1, w2, b2, *, mxu_dtype=jnp.bfloat16, force_h_tiling=False, th=None):
    """x: (B, T, d).  w1: (d, h), b1: (h,), w2: (h, d), b2: (d,), h = 4*d.

    Weights are stored pre-transposed as (in, out) so the kernel computes x @ W + b,
    matching torch.nn.Linear's x @ W.T + b semantics.
    """
    B, T, d = x.shape
    h = w1.shape[1]
    M = B * T
    x2 = x.reshape(M, d)

    # MXU operands in bf16 (halves weight VMEM + bf16-native MXU); biases stay f32.
    w1c = w1.astype(mxu_dtype)
    w2c = w2.astype(mxu_dtype)
    b1r = b1.reshape(1, h).astype(jnp.float32)
    b2r = b2.reshape(1, d).astype(jnp.float32)

    vmem_limit = _vmem_limit_bytes()
    tm = _pick_tm(M)

    weight_bytes = 2 * d * h * jnp.dtype(mxu_dtype).itemsize
    use_h_tiling = force_h_tiling or (weight_bytes > vmem_limit // 3)
    if use_h_tiling:
        th = th if (th is not None and h % th == 0) else _pick_th(h)
        if th is None:
            use_h_tiling = False  # h not a multiple of 128: fall back to resident weights

    last_exc = None
    for single_buffer in (True, False):  # fall back if Buffered(1) is unsupported by this jax
        try:
            if use_h_tiling:
                out2 = _htiled_call(x2, w1c, b1r, w2c, b2r, tm=tm, th=th,
                                    mxu_dtype=mxu_dtype, vmem_limit=vmem_limit,
                                    single_buffer_weights=single_buffer)
            else:
                out2 = _resident_call(x2, w1c, b1r, w2c, b2r, tm=tm,
                                      mxu_dtype=mxu_dtype, vmem_limit=vmem_limit,
                                      single_buffer_weights=single_buffer)
            return out2.reshape(B, T, d)
        except Exception as e:  # pragma: no cover
            last_exc = e
    raise last_exc


# ------------------------- Pure-JAX reference (mirrors the PyTorch forward) -------------------------
def _reference(x, w1, b1, w2, b2, mxu_dtype=jnp.float32):
    md = mxu_dtype
    hid = jnp.dot(x.astype(md), w1.astype(md), preferred_element_type=jnp.float32) + b1
    hid = _gelu_tanh_f32(hid)
    return jnp.dot(hid.astype(md), w2.astype(md), preferred_element_type=jnp.float32) + b2


if __name__ == "__main__":
    key = jax.random.PRNGKey(0)

    def make_inputs(key, B, T, d):
        h = 4 * d
        kx, k1, kb1, k2, kb2 = jax.random.split(key, 5)
        x = jax.random.normal(kx, (B, T, d), jnp.float32)
        w1 = jax.random.normal(k1, (d, h), jnp.float32) / math.sqrt(d)
        b1 = 0.1 * jax.random.normal(kb1, (h,), jnp.float32)
        w2 = jax.random.normal(k2, (h, d), jnp.float32) / math.sqrt(h)
        b2 = 0.1 * jax.random.normal(kb2, (d,), jnp.float32)
        return x, w1, b1, w2, b2

    # --- Test 1: toy GPT config (emb_dim=32 -> hidden=128), resident-weight path ---
    k1_, k2_ = jax.random.split(key)
    x, w1, b1, w2, b2 = make_inputs(k1_, B=2, T=8, d=32)
    out = jax.block_until_ready(feed_forward(x, w1, b1, w2, b2))
    assert out.shape == x.shape
    ref_bf = _reference(x, w1, b1, w2, b2, mxu_dtype=jnp.bfloat16)
    ref_f32 = _reference(x, w1, b1, w2, b2, mxu_dtype=jnp.float32)
    assert jnp.allclose(out, ref_bf, atol=3e-3, rtol=3e-3), "resident path: mismatch vs bf16-operand reference"
    assert jnp.allclose(out, ref_f32, atol=5e-2, rtol=5e-2), "resident path: mismatch vs f32 reference"

    # --- Test 2: force the h-tiled accumulator path (used for large d / v7x VMEM budgets) ---
    x, w1, b1, w2, b2 = make_inputs(k2_, B=2, T=16, d=128)
    out = jax.block_until_ready(feed_forward(x, w1, b1, w2, b2, force_h_tiling=True, th=128))
    assert out.shape == x.shape
    ref_bf = _reference(x, w1, b1, w2, b2, mxu_dtype=jnp.bfloat16)
    ref_f32 = _reference(x, w1, b1, w2, b2, mxu_dtype=jnp.float32)
    assert jnp.allclose(out, ref_bf, atol=3e-3, rtol=3e-3), "h-tiled path: mismatch vs bf16-operand reference"
    assert jnp.allclose(out, ref_f32, atol=5e-2, rtol=5e-2), "h-tiled path: mismatch vs f32 reference"

    print("KERNEL_OK")
</pallas_src>

<mosaic_0001>
module attributes {stable_mosaic.version = 11 : i64} {
  func.func @_ffn_kernel_resident(%arg0: i32, %arg1: memref<8x32xf32, #tpu.memory_space<vmem>>, %arg2: memref<32x128xbf16, #tpu.memory_space<vmem>>, %arg3: memref<1x128xf32, #tpu.memory_space<vmem>>, %arg4: memref<128x32xbf16, #tpu.memory_space<vmem>>, %arg5: memref<1x32xf32, #tpu.memory_space<vmem>>, %arg6: memref<8x32xf32, #tpu.memory_space<vmem>>) attributes {dimension_semantics = [#tpu.dimension_semantics<parallel>], iteration_bounds = array<i64: 2>, scalar_prefetch = 0 : i64, scratch_operands = 0 : i64, tpu.core_type = #tpu.core_type<tc>, window_params = [{transform_indices = @transform_0, window_bounds = array<i64: 8, 32>}, {pipeline_mode = #tpu.pipeline_mode<synchronous>, transform_indices = @transform_1, window_bounds = array<i64: 32, 128>}, {pipeline_mode = #tpu.pipeline_mode<synchronous>, transform_indices = @transform_2, window_bounds = array<i64: 1, 128>}, {pipeline_mode = #tpu.pipeline_mode<synchronous>, transform_indices = @transform_3, window_bounds = array<i64: 128, 32>}, {pipeline_mode = #tpu.pipeline_mode<synchronous>, transform_indices = @transform_4, window_bounds = array<i64: 1, 32>}, {transform_indices = @transform_5, window_bounds = array<i64: 8, 32>}]} {
    %c0 = arith.constant 0 : index
    %c0_0 = arith.constant 0 : index
    %0 = vector.load %arg1[%c0, %c0_0] : memref<8x32xf32, #tpu.memory_space<vmem>>, vector<8x32xf32>
    %1 = arith.truncf %0 : vector<8x32xf32> to vector<8x32xbf16>
    %c0_1 = arith.constant 0 : index
    %c0_2 = arith.constant 0 : index
    %2 = vector.load %arg2[%c0_1, %c0_2] : memref<32x128xbf16, #tpu.memory_space<vmem>>, vector<32x128xbf16>
    %cst = arith.constant dense<0.000000e+00> : vector<8x128xf32>
    %3 = tpu.matmul %1, %2, %cst {dimension_numbers = #tpu.dot_dimension_numbers<[1], [0], [0], [1], [0, 0, 1, 1], [], []>} : vector<8x32xbf16>, vector<32x128xbf16>, vector<8x128xf32> -> vector<8x128xf32>
    %c0_3 = arith.constant 0 : index
    %c0_4 = arith.constant 0 : index
    %4 = vector.load %arg3[%c0_3, %c0_4] : memref<1x128xf32, #tpu.memory_space<vmem>>, vector<1x128xf32>
    %5 = vector.broadcast %4 : vector<1x128xf32> to vector<8x128xf32>
    %6 = arith.addf %3, %5 : vector<8x128xf32>
    %cst_5 = arith.constant 5.000000e-01 : f32
    %7 = vector.broadcast %cst_5 : f32 to vector<8x128xf32>
    %8 = arith.mulf %7, %6 : vector<8x128xf32>
    %cst_6 = arith.constant 4.471500e-02 : f32
    %9 = vector.broadcast %cst_6 : f32 to vector<8x128xf32>
    %10 = arith.mulf %9, %6 : vector<8x128xf32>
    %11 = arith.mulf %10, %6 : vector<8x128xf32>
    %12 = arith.mulf %11, %6 : vector<8x128xf32>
    %13 = arith.addf %6, %12 : vector<8x128xf32>
    %cst_7 = arith.constant 0.797884583 : f32
    %14 = vector.broadcast %cst_7 : f32 to vector<8x128xf32>
    %15 = arith.mulf %14, %13 : vector<8x128xf32>
    %16 = math.tanh %15 : vector<8x128xf32>
    %cst_8 = arith.constant 1.000000e+00 : f32
    %17 = vector.broadcast %cst_8 : f32 to vector<8x128xf32>
    %18 = arith.addf %17, %16 : vector<8x128xf32>
    %19 = arith.mulf %8, %18 : vector<8x128xf32>
    %20 = arith.truncf %19 : vector<8x128xf32> to vector<8x128xbf16>
    %c0_9 = arith.constant 0 : index
    %c0_10 = arith.constant 0 : index
    %21 = vector.load %arg4[%c0_9, %c0_10] : memref<128x32xbf16, #tpu.memory_space<vmem>>, vector<128x32xbf16>
    %cst_11 = arith.constant dense<0.000000e+00> : vector<8x32xf32>
    %22 = tpu.matmul %20, %21, %cst_11 {dimension_numbers = #tpu.dot_dimension_numbers<[1], [0], [0], [1], [0, 0, 1, 1], [], []>} : vector<8x128xbf16>, vector<128x32xbf16>, vector<8x32xf32> -> vector<8x32xf32>
    %c0_12 = arith.constant 0 : index
    %c0_13 = arith.constant 0 : index
    %23 = vector.load %arg5[%c0_12, %c0_13] : memref<1x32xf32, #tpu.memory_space<vmem>>, vector<1x32xf32>
    %24 = vector.broadcast %23 : vector<1x32xf32> to vector<8x32xf32>
    %25 = arith.addf %22, %24 : vector<8x32xf32>
    %c0_14 = arith.constant 0 : index
    %c0_15 = arith.constant 0 : index
    %26 = vector.load %arg6[%c0_14, %c0_15] : memref<8x32xf32, #tpu.memory_space<vmem>>, vector<8x32xf32>
    tpu.vector_store %arg6[%c0_14, %c0_15], %25 {strides = array<i32>} : memref<8x32xf32, #tpu.memory_space<vmem>>, vector<8x32xf32>,
    return
  }
  func.func @transform_0(%arg0: i32) -> (i32, i32) {
    %c0_i32 = arith.constant 0 : i32
    %c0_i32_0 = arith.constant 0 : i32
    return %arg0, %c0_i32 : i32, i32
  }
  func.func @transform_1(%arg0: i32) -> (i32, i32) {
    %c0_i32 = arith.constant 0 : i32
    %c0_i32_0 = arith.constant 0 : i32
    %c0_i32_1 = arith.constant 0 : i32
    return %c0_i32, %c0_i32_0 : i32, i32
  }
  func.func @transform_2(%arg0: i32) -> (i32, i32) {
    %c0_i32 = arith.constant 0 : i32
    %c0_i32_0 = arith.constant 0 : i32
    %c0_i32_1 = arith.constant 0 : i32
    return %c0_i32, %c0_i32_0 : i32, i32
  }
  func.func @transform_3(%arg0: i32) -> (i32, i32) {
    %c0_i32 = arith.constant 0 : i32
    %c0_i32_0 = arith.constant 0 : i32
    %c0_i32_1 = arith.constant 0 : i32
    return %c0_i32, %c0_i32_0 : i32, i32
  }
  func.func @transform_4(%arg0: i32) -> (i32, i32) {
    %c0_i32 = arith.constant 0 : i32
    %c0_i32_0 = arith.constant 0 : i32
    %c0_i32_1 = arith.constant 0 : i32
    return %c0_i32, %c0_i32_0 : i32, i32
  }
  func.func @transform_5(%arg0: i32) -> (i32, i32) {
    %c0_i32 = arith.constant 0 : i32
    %c0_i32_0 = arith.constant 0 : i32
    return %arg0, %c0_i32 : i32, i32
  }
}

module attributes {stable_mosaic.version = 11 : i64} {
  func.func @_ffn_kernel_resident(%arg0: i32, %arg1: memref<8x32xf32, #tpu.memory_space<vmem>>, %arg2: memref<32x128xbf16, #tpu.memory_space<vmem>>, %arg3: memref<1x128xf32, #tpu.memory_space<vmem>>, %arg4: memref<128x32xbf16, #tpu.memory_space<vmem>>, %arg5: memref<1x32xf32, #tpu.memory_space<vmem>>, %arg6: memref<8x32xf32, #tpu.memory_space<vmem>>) attributes {dimension_semantics = [#tpu.dimension_semantics<parallel>], iteration_bounds = array<i64: 2>, scalar_prefetch = 0 : i64, scratch_operands = 0 : i64, tpu.core_type = #tpu.core_type<tc>, window_params = [{transform_indices = @transform_0, window_bounds = array<i64: 8, 32>}, {pipeline_mode = #tpu.pipeline_mode<synchronous>, transform_indices = @transform_1, window_bounds = array<i64: 32, 128>}, {pipeline_mode = #tpu.pipeline_mode<synchronous>, transform_indices = @transform_2, window_bounds = array<i64: 1, 128>}, {pipeline_mode = #tpu.pipeline_mode<synchronous>, transform_indices = @transform_3, window_bounds = array<i64: 128, 32>}, {pipeline_mode = #tpu.pipeline_mode<synchronous>, transform_indices = @transform_4, window_bounds = array<i64: 1, 32>}, {transform_indices = @transform_5, window_bounds = array<i64: 8, 32>}]} {
    %c0 = arith.constant 0 : index
    %c0_0 = arith.constant 0 : index
    %0 = vector.load %arg1[%c0, %c0_0] : memref<8x32xf32, #tpu.memory_space<vmem>>, vector<8x32xf32>
    %1 = arith.truncf %0 : vector<8x32xf32> to vector<8x32xbf16>
    %c0_1 = arith.constant 0 : index
    %c0_2 = arith.constant 0 : index
    %2 = vector.load %arg2[%c0_1, %c0_2] : memref<32x128xbf16, #tpu.memory_space<vmem>>, vector<32x128xbf16>
    %cst = arith.constant dense<0.000000e+00> : vector<8x128xf32>
    %3 = tpu.matmul %1, %2, %cst {dimension_numbers = #tpu.dot_dimension_numbers<[1], [0], [0], [1], [0, 0, 1, 1], [], []>} : vector<8x32xbf16>, vector<32x128xbf16>, vector<8x128xf32> -> vector<8x128xf32>
    %c0_3 = arith.constant 0 : index
    %c0_4 = arith.constant 0 : index
    %4 = vector.load %arg3[%c0_3, %c0_4] : memref<1x128xf32, #tpu.memory_space<vmem>>, vector<1x128xf32>
    %5 = vector.broadcast %4 : vector<1x128xf32> to vector<8x128xf32>
    %6 = arith.addf %3, %5 : vector<8x128xf32>
    %cst_5 = arith.constant 5.000000e-01 : f32
    %7 = vector.broadcast %cst_5 : f32 to vector<8x128xf32>
    %8 = arith.mulf %7, %6 : vector<8x128xf32>
    %cst_6 = arith.constant 4.471500e-02 : f32
    %9 = vector.broadcast %cst_6 : f32 to vector<8x128xf32>
    %10 = arith.mulf %9, %6 : vector<8x128xf32>
    %11 = arith.mulf %10, %6 : vector<8x128xf32>
    %12 = arith.mulf %11, %6 : vector<8x128xf32>
    %13 = arith.addf %6, %12 : vector<8x128xf32>
    %cst_7 = arith.constant 0.797884583 : f32
    %14 = vector.broadcast %cst_7 : f32 to vector<8x128xf32>
    %15 = arith.mulf %14, %13 : vector<8x128xf32>
    %16 = math.tanh %15 : vector<8x128xf32>
    %cst_8 = arith.constant 1.000000e+00 : f32
    %17 = vector.broadcast %cst_8 : f32 to vector<8x128xf32>
    %18 = arith.addf %17, %16 : vector<8x128xf32>
    %19 = arith.mulf %8, %18 : vector<8x128xf32>
    %20 = arith.truncf %19 : vector<8x128xf32> to vector<8x128xbf16>
    %c0_9 = arith.constant 0 : index
    %c0_10 = arith.constant 0 : index
    %21 = vector.load %arg4[%c0_9, %c0_10] : memref<128x32xbf16, #tpu.memory_space<vmem>>, vector<128x32xbf16>
    %cst_11 = arith.constant dense<0.000000e+00> : vector<8x32xf32>
    %22 = tpu.matmul %20, %21, %cst_11 {dimension_numbers = #tpu.dot_dimension_numbers<[1], [0], [0], [1], [0, 0, 1, 1], [], []>} : vector<8x128xbf16>, vector<128x32xbf16>, vector<8x32xf32> -> vector<8x32xf32>
    %c0_12 = arith.constant 0 : index
    %c0_13 = arith.constant 0 : index
    %23 = vector.load %arg5[%c0_12, %c0_13] : memref<1x32xf32, #tpu.memory_space<vmem>>, vector<1x32xf32>
    %24 = vector.broadcast %23 : vector<1x32xf32> to vector<8x32xf32>
    %25 = arith.addf %22, %24 : vector<8x32xf32>
    %c0_14 = arith.constant 0 : index
    %c0_15 = arith.constant 0 : index
    %26 = vector.load %arg6[%c0_14, %c0_15] : memref<8x32xf32, #tpu.memory_space<vmem>>, vector<8x32xf32>
    tpu.vector_store %arg6[%c0_14, %c0_15], %25 {strides = array<i32>} : memref<8x32xf32, #tpu.memory_space<vmem>>, vector<8x32xf32>,
    return
  }
  func.func @transform_0(%arg0: i32) -> (i32, i32) {
    %c0_i32 = arith.constant 0 : i32
    %c0_i32_0 = arith.constant 0 : i32
    return %arg0, %c0_i32 : i32, i32
  }
  func.func @transform_1(%arg0: i32) -> (i32, i32) {
    %c0_i32 = arith.constant 0 : i32
    %c0_i32_0 = arith.constant 0 : i32
    %c0_i32_1 = arith.constant 0 : i32
    return %c0_i32, %c0_i32_0 : i32, i32
  }
  func.func @transform_2(%arg0: i32) -> (i32, i32) {
    %c0_i32 = arith.constant 0 : i32
    %c0_i32_0 = arith.constant 0 : i32
    %c0_i32_1 = arith.constant 0 : i32
    return %c0_i32, %c0_i32_0 : i32, i32
  }
  func.func @transform_3(%arg0: i32) -> (i32, i32) {
    %c0_i32 = arith.constant 0 : i32
    %c0_i32_0 = arith.constant 0 : i32
    %c0_i32_1 = arith.constant 0 : i32
    return %c0_i32, %c0_i32_0 : i32, i32
  }
  func.func @transform_4(%arg0: i32) -> (i32, i32) {
    %c0_i32 = arith.constant 0 : i32
    %c0_i32_0 = arith.constant 0 : i32
    %c0_i32_1 = arith.constant 0 : i32
    return %c0_i32, %c0_i32_0 : i32, i32
  }
  func.func @transform_5(%arg0: i32) -> (i32, i32) {
    %c0_i32 = arith.constant 0 : i32
    %c0_i32_0 = arith.constant 0 : i32
    return %arg0, %c0_i32 : i32, i32
  }
}

</mosaic_0001>

<bundles_post_ra>
// kernel: tpu_custom_call.1
= control target key start
LH: loop header
LB: loop body
LE: loop exit
PB: predicated region body
PF: predicated region fallthrough
CT: control target
= control target key end

     0   :  { %10 = vsyncpa [#allocation3], 0  ;;  %s833_s0 = inlined_call_operand.vmem [shape: f32[16,32], index: 0, kind: input, shape index: {}]   ;;  %s834_s1 = inlined_call_operand.vmem [shape: bf16[32,128], index: 1, kind: input, shape index: {}]   ;;  %s835_s2 = inlined_call_operand.vmem [shape: f32[1,128], index: 2, kind: input, shape index: {}]   ;;  %s836_s3 = inlined_call_operand.vmem [shape: bf16[128,32], index: 3, kind: input, shape index: {}]   ;;  %s837_s4 = inlined_call_operand.vmem [shape: f32[1,32], index: 4, kind: input, shape index: {}]   ;;  %s838_s5 = inlined_call_operand.hbm [shape: f32[16,32], index: 5, kind: output, shape index: {}]  }
   0x1   :  { %12 = vsyncpa [#allocation3 + $0x1], 0  ;;  %s696_s18 = smov 0   ;;  %s698_s19 = smov 0  }
   0x2   :  { %s700_s20 = smov 0   ;;  %s702_s21 = smov 0  }
   0x3 LB: > { %s717_s22 = sadd.s32 4294967295, %s661_s21   ;;  %s485_s23 = sadd.s32 4294967294, %s661_s21   ;;  %s661_s21 = sphi %s702_s21, %s844_s21   ;;  %s657_s20 = sphi %s700_s20, %s843_s20   ;;  %s653_s19 = sphi %s698_s19, %s842_s19   ;;  %s649_s18 = sphi %s696_s18, %s841_s18  }
   0x4   : > { %s721_s24 = sadd.s32 1, %s661_s21   ;;  %s135_s25 = sadd.s32 1, %s657_s20 }
   0x5   : > { %s132_s26 = ssub.s32 %s661_s21, %s721_s24  ;;  %p145_p0 = scmp.ne.s32.totalorder %s657_s20, %s653_s19 }
   0x6   : > { %p133_p1 = scmp.eq.s32.totalorder %s132_s26, 0  ;;  %p146_p2 = scmp.eq.s32.totalorder %s717_s22, 1 }
   0x7   : > { %p151_p3 = scmp.ne.s32.totalorder %s653_s19, %s649_s18  ;;  %p152_p4 = scmp.eq.s32.totalorder %s485_s23, 1 }
   0x8   : > { %s732_s27 = scalar_select %p133_p1, %s657_s20, %s135_s25  }
   0x9   : > { %p734_p5 = por %p146_p2, %p145_p0  ;;  %p738_p6 = por %p152_p4, %p151_p3 }
   0xa   : > { %p488_p7 = scmp.ge.s32.totalorder %s661_s21, 1  ;;  %p189_p8 = scmp.lt.s32.totalorder %s661_s21, 3 }
   0xc   : > { %p190_p9 = pnand %p488_p7, %p189_p8 }
   0xd   : > { %p216_p10 = scmp.lt.s32.totalorder (!%p190_p9), %s717_s22, 1  ;;  %s213_s16 = sand.u32 (!%p190_p9), 1, %s653_s19  }
   0xe   : > { %193 = sbr.rel (%p190_p9) target bundleno = 462 (0x1ce), region = 40  ;;  %s489_s17 = sshll.u32 (!%p190_p9), %s213_s16, 3 }
   0xf   : > { %s505_s26 = sshll.u32 (!%p190_p9), %s717_s22, 7  ;;  %s215_s30 = scalar_lea.vmem (!%p190_p9), [#allocation2], %s489_s17 }
  0x10   : > { %s426_s6 = sshll.u32 (!%p190_p9), %s215_s30, 4  ;;  %s665_s11 = smov (!%p190_p9), [#allocation2]   ;;  %s793_s6 = int_to_ptr.vmem [resolvable:$true] %s426_s6 }
  0x11   : > { %s605_s12 = sshll.u32 (!%p190_p9), %s665_s11, 4  ;;  %s606_s12 = int_to_ptr.vmem [resolvable:$false] %s605_s12 }
  0x12   : > { %p608_p0 = scmp.lt.s32.totalorder (!%p190_p9), %s793_s6, %s606_s12 }
  0x13   : > { %v589_v0 = vld [vmem:[%s834_s1 + $0x8] sm:$0xff]   ;;  %v663_v1 = vmov 0.0   ;;  %v590_v2 = vld [vmem:[%s834_s1] sm:$0xff]   ;;  %vm664_vm0 = vmmov 0   ;;  %s217_s9 = scalar_select %p216_p10, %s717_s22, 1  ;;  %vm246_vm1 = vcmask 261120  }
  0x14   : > { %520 = vmatprep.subr.bf16.mxu0 %v663_v1  ;;  %528 = vmatprep.subr.bf16.mxu1 %v663_v1  ;;  %v591_v5 = vld [vmem:[%s836_s3 + $0x38] sm:$0xff]   ;;  %v592_v6 = vld [vmem:[%s836_s3 + $0x30] sm:$0xff]   ;;  %v593_v7 = vld [vmem:[%s836_s3 + $0x28] sm:$0xff]   ;;  %s601_s22 = scalar_lea.vmem %s793_s6, 128 }
  0x15   : > { %521 = vmatpush3.bf16.msra.mxu0 %v589_v0  ;;  %524 = vmatprep.mubr.msk.bf16.mxu0 %vm664_vm0, %v663_v1  ;;  %s490_s10 = sshll.u32 %s217_s9, 3  ;;  %v594_v8 = vld [vmem:[%s836_s3 + $0x20] sm:$0xff]   ;;  %v595_v9 = vld [vmem:[%s836_s3 + $0x18] sm:$0xff]   ;;  %v596_v10 = vld [vmem:[%s836_s3 + $0x10] sm:$0xff]   ;;  %s791_s9 = scalar_lea.hbm %s838_s5, %s505_s26 }
  0x16   : > { %522 = vmatprep.subr.bf16.mxu0 %v663_v1  ;;  %544 = vmatprep.mubr.msk.bf16.mxu1 %vm664_vm0, %v663_v1  ;;  %s219_s13 = scalar_lea.vmem %s833_s0, %s490_s10  ;;  %v597_v11 = vld [vmem:[%s836_s3 + $0x8] sm:$0xff]   ;;  %v598_v12 = vld [vmem:[%s836_s3] sm:$0xff]   ;;  %s413_s10 = scalar_lea.sflag [#allocation3], %s213_s16 }
  0x17   : > { %v221_v3 = vld [vmem:[%s219_s13] sm:$0xff]  ;;  %529 = vmatpush3.bf16.msra.mxu1 %v591_v5  ;;  %p602_p11 = scmp.ne.s32.totalorder %s793_s6, %s601_s22  ;;  %s607_s13 = scalar_lea.vmem %s606_s12, 256 }
  0x18   : > { %v222_v4 = vpack.c.bf16 %v221_v3, %v221_v3  ;;  %530 = vmatprep.subr.bf16.mxu1 %v663_v1  ;;  %v491_v13 = vld [vmem:[%s835_s2] ss:$0 sm:$0xff]  ;;  %p609_p1 = scmp.lt.s32.totalorder %s607_s13, %s601_s22 }
  0x19   : > { %523 = vmatpush3.bf16.msra.mxu0 %v590_v2  ;;  %v495_v29 = vld [vmem:[%s837_s4] ss:$0 sm:$0xff]  ;;  %p603_p12 = pnand %p602_p11, %p734_p5 }
  0x1a   : > { %p610_p2 = por %p609_p1, %p608_p0 }
  0x1b   : > { %531 = vmatpush3.bf16.msra.mxu1 %v592_v6  ;;  %p604_p13 = pneg %p603_p12 }
  0x1c   : > { %525 = vmatmul.mubr.msk.bf16.vlgmr.msra.gmra.mxu0 %vm246_vm1, %v222_v4  ;;  %532 = vmatprep.subr.bf16.mxu1 %v663_v1 }
  0x1d   : > { %p611_p3 = pnand %p610_p2, %p604_p13 }
  0x1f   : > { %533 = vmatpush3.bf16.msra.mxu1 %v593_v7 }
  0x20   : > { %534 = vmatprep.subr.bf16.mxu1 %v663_v1 }
  0x23   : > { %535 = vmatpush3.bf16.msra.mxu1 %v594_v8 }
  0x24   : > { %536 = vmatprep.subr.bf16.mxu1 %v663_v1 }
  0x27   : > { %537 = vmatpush3.bf16.msra.mxu1 %v595_v9 }
  0x28   : > { %538 = vmatprep.subr.bf16.mxu1 %v663_v1 }
  0x2b   : > { %539 = vmatpush3.bf16.msra.mxu1 %v596_v10 }
  0x2c   : > { %540 = vmatprep.subr.bf16.mxu1 %v663_v1 }
  0x2f   : > { %541 = vmatpush3.bf16.msra.mxu1 %v597_v11 }
  0x30   : > { %542 = vmatprep.subr.bf16.mxu1 %v663_v1 }
  0x33   : > { %543 = vmatpush3.bf16.msra.mxu1 %v598_v12 }
  0xdc   : > { %v284_v14 = vpop.f32.mrf.mxu0 }
  0xdd   : > { %v285_v15 = vadd.f32 %v491_v13, %v284_v14 }
  0xde   : > { %v526_v16 = vpop.f32.mrf.mxu0 }
  0xdf   : > { %v291_v17 = vmul.f32 0.044715, %v285_v15  ;;  %v290_v25 = vmul.f32 0.5, %v285_v15 }
  0xe0   : > { %v287_v18 = vpop.f32.mrf.mxu0 }
  0xe1   : > { %v292_v19 = vmul.f32 %v291_v17, %v285_v15 }
  0xe2   : > { %v527_v20 = vpop.f32.mrf.mxu0 }
  0xe3   : > { %v293_v21 = vmul.f32 %v292_v19, %v285_v15 }
  0xe5   : > { %v294_v22 = vadd.f32 %v293_v21, %v285_v15 }
  0xe7   : > { %v295_v23 = vmul.f32 0.7978846, %v294_v22 }
  0xe9   : > { %599 = vtanh.f32 %v295_v23 }
  0xf6   : > { %v600_v24 = vpop.eup %599 }
  0xf7   : > { %v297_v26 = vadd.f32 1.0, %v600_v24 }
  0xf9   : > { %v298_v27 = vmul.f32 %v297_v26, %v290_v25 }
  0xfb   : > { %v299_v28 = vpack.c.bf16 %v298_v27, %v298_v27 }
  0xfd   : > { %545 = vmatmul.mubr.bf16.vlgmr.msra.gmra.mxu1 %v299_v28 }
 0x1bd   : > { %v405_v30 = vpop.f32.mrf.mxu1 }
 0x1be   : > { %v406_v31 = vadd.f32 %v495_v29, %v405_v30 }
 0x1bf   : > { %v546_v32 = vpop.f32.mrf.mxu1 }
 0x1c0   : > { %411 = vst.msk [vmem:[%s215_s30] sm:$0xff] %vm246_vm1, %v406_v31 }
 0x1c1   : > { %v408_v33 = vpop.f32.mrf.mxu1 }
 0x1c2   : > { %614 = shalt.err (!%p611_p3)
}
 0x1c3   : > { %s615_s14 = scalar_lea.hbm %s791_s9, 128  ;;  %s619_s17 = scalar_lea.hbm %s838_s5, 256 }
 0x1c4   : > { %p616_p4 = scmp.ne.s32.totalorder %s791_s9, %s615_s14  ;;  %p620_p9 = scmp.lt.s32.totalorder %s791_s9, %s838_s5 }
 0x1c5   : > { %p621_p10 = scmp.lt.s32.totalorder %s619_s17, %s615_s14 }
 0x1c6   : > { %p617_p7 = pnand %p616_p4, %p734_p5 }
 0x1c7   : > { %p622_p11 = por %p621_p10, %p620_p9 }
 0x1c8   : > { %p618_p8 = pneg %p617_p7 }
 0x1ca   : > { %p623_p12 = pnand %p622_p11, %p618_p8 }
 0x1cc   : > { %626 = shalt.err (!%p623_p12)
}
 0x1cd   : > { %548 = dma.vmem_to_hbm [thread:$0]  (%p734_p5), %s793_s6, 128, %s791_s9, %s413_s10   ;;  %v547_v34 = vpop.f32.mrf.mxu1 }
 0x1ce PF: > { %p554_p13 = scmp.ge.s32.totalorder %s661_s21, 2  ;;  %s438_s26 = sand.u32 1, %s649_s18  }
 0x1cf   : > { %s439_s30 = scalar_lea.sflag [#allocation3], %s438_s26 }
 0x1d0   : > { %p551_p0 = pnand %p554_p13, %p738_p6 }
 0x1d2   : > { %p552_p1 = pneg %p551_p0 }
 0x1d4   : > { %644 = dma.done.wait (%p552_p1), %s439_s30, 128  }
 0x1d5   : > { %646 = vsyncadd (%p552_p1), %s439_s30, 4294967168  ;;  %p15_p2 = scmp.ge.s32.totalorder %s721_s24, 4   ;;  %s841_s18 = smov %s653_s19 }
 0x1d6   : > { %s842_s19 = smov %s657_s20  ;;  %s843_s20 = smov %s732_s27 }
 0x1d7   : > { %s844_s21 = smov %s721_s24  ;;  %17 = sbr.rel (!%p15_p2) target bundleno = 3 (0x3), region = 75 }
 0x1dc   :  { %444 = vsyncpa [#allocation3], 1 }
 0x1dd   :  { %446 = vsyncpa [#allocation3 + $0x1], 1 }

// kernel: tpu_custom_call.1
= control target key start
LH: loop header
LB: loop body
LE: loop exit
PB: predicated region body
PF: predicated region fallthrough
CT: control target
= control target key end

     0   :  { %10 = vsyncpa [#allocation3], 0  ;;  %s833_s0 = inlined_call_operand.vmem [shape: f32[16,32], index: 0, kind: input, shape index: {}]   ;;  %s834_s1 = inlined_call_operand.vmem [shape: bf16[32,128], index: 1, kind: input, shape index: {}]   ;;  %s835_s2 = inlined_call_operand.vmem [shape: f32[1,128], index: 2, kind: input, shape index: {}]   ;;  %s836_s3 = inlined_call_operand.vmem [shape: bf16[128,32], index: 3, kind: input, shape index: {}]   ;;  %s837_s4 = inlined_call_operand.vmem [shape: f32[1,32], index: 4, kind: input, shape index: {}]   ;;  %s838_s5 = inlined_call_operand.hbm [shape: f32[16,32], index: 5, kind: output, shape index: {}]  }
   0x1   :  { %12 = vsyncpa [#allocation3 + $0x1], 0  ;;  %s696_s18 = smov 0   ;;  %s698_s19 = smov 0  }
   0x2   :  { %s700_s20 = smov 0   ;;  %s702_s21 = smov 0  }
   0x3 LB: > { %s717_s22 = sadd.s32 4294967295, %s661_s21   ;;  %s485_s23 = sadd.s32 4294967294, %s661_s21   ;;  %s661_s21 = sphi %s702_s21, %s844_s21   ;;  %s657_s20 = sphi %s700_s20, %s843_s20   ;;  %s653_s19 = sphi %s698_s19, %s842_s19   ;;  %s649_s18 = sphi %s696_s18, %s841_s18  }
   0x4   : > { %s721_s24 = sadd.s32 1, %s661_s21   ;;  %s135_s25 = sadd.s32 1, %s657_s20 }
   0x5   : > { %s132_s26 = ssub.s32 %s661_s21, %s721_s24  ;;  %p145_p0 = scmp.ne.s32.totalorder %s657_s20, %s653_s19 }
   0x6   : > { %p133_p1 = scmp.eq.s32.totalorder %s132_s26, 0  ;;  %p146_p2 = scmp.eq.s32.totalorder %s717_s22, 1 }
   0x7   : > { %p151_p3 = scmp.ne.s32.totalorder %s653_s19, %s649_s18  ;;  %p152_p4 = scmp.eq.s32.totalorder %s485_s23, 1 }
   0x8   : > { %s732_s27 = scalar_select %p133_p1, %s657_s20, %s135_s25  }
   0x9   : > { %p734_p5 = por %p146_p2, %p145_p0  ;;  %p738_p6 = por %p152_p4, %p151_p3 }
   0xa   : > { %p488_p7 = scmp.ge.s32.totalorder %s661_s21, 1  ;;  %p189_p8 = scmp.lt.s32.totalorder %s661_s21, 3 }
   0xc   : > { %p190_p9 = pnand %p488_p7, %p189_p8 }
   0xd   : > { %p216_p10 = scmp.lt.s32.totalorder (!%p190_p9), %s717_s22, 1  ;;  %s213_s16 = sand.u32 (!%p190_p9), 1, %s653_s19  }
   0xe   : > { %193 = sbr.rel (%p190_p9) target bundleno = 462 (0x1ce), region = 40  ;;  %s489_s17 = sshll.u32 (!%p190_p9), %s213_s16, 3 }
   0xf   : > { %s505_s26 = sshll.u32 (!%p190_p9), %s717_s22, 7  ;;  %s215_s30 = scalar_lea.vmem (!%p190_p9), [#allocation2], %s489_s17 }
  0x10   : > { %s426_s6 = sshll.u32 (!%p190_p9), %s215_s30, 4  ;;  %s665_s11 = smov (!%p190_p9), [#allocation2]   ;;  %s793_s6 = int_to_ptr.vmem [resolvable:$true] %s426_s6 }
  0x11   : > { %s605_s12 = sshll.u32 (!%p190_p9), %s665_s11, 4  ;;  %s606_s12 = int_to_ptr.vmem [resolvable:$false] %s605_s12 }
  0x12   : > { %p608_p0 = scmp.lt.s32.totalorder (!%p190_p9), %s793_s6, %s606_s12 }
  0x13   : > { %v589_v0 = vld [vmem:[%s834_s1 + $0x8] sm:$0xff]   ;;  %v663_v1 = vmov 0.0   ;;  %v590_v2 = vld [vmem:[%s834_s1] sm:$0xff]   ;;  %vm664_vm0 = vmmov 0   ;;  %s217_s9 = scalar_select %p216_p10, %s717_s22, 1  ;;  %vm246_vm1 = vcmask 261120  }
  0x14   : > { %520 = vmatprep.subr.bf16.mxu0 %v663_v1  ;;  %528 = vmatprep.subr.bf16.mxu1 %v663_v1  ;;  %v591_v5 = vld [vmem:[%s836_s3 + $0x38] sm:$0xff]   ;;  %v592_v6 = vld [vmem:[%s836_s3 + $0x30] sm:$0xff]   ;;  %v593_v7 = vld [vmem:[%s836_s3 + $0x28] sm:$0xff]   ;;  %s601_s22 = scalar_lea.vmem %s793_s6, 128 }
  0x15   : > { %521 = vmatpush3.bf16.msra.mxu0 %v589_v0  ;;  %524 = vmatprep.mubr.msk.bf16.mxu0 %vm664_vm0, %v663_v1  ;;  %s490_s10 = sshll.u32 %s217_s9, 3  ;;  %v594_v8 = vld [vmem:[%s836_s3 + $0x20] sm:$0xff]   ;;  %v595_v9 = vld [vmem:[%s836_s3 + $0x18] sm:$0xff]   ;;  %v596_v10 = vld [vmem:[%s836_s3 + $0x10] sm:$0xff]   ;;  %s791_s9 = scalar_lea.hbm %s838_s5, %s505_s26 }
  0x16   : > { %522 = vmatprep.subr.bf16.mxu0 %v663_v1  ;;  %544 = vmatprep.mubr.msk.bf16.mxu1 %vm664_vm0, %v663_v1  ;;  %s219_s13 = scalar_lea.vmem %s833_s0, %s490_s10  ;;  %v597_v11 = vld [vmem:[%s836_s3 + $0x8] sm:$0xff]   ;;  %v598_v12 = vld [vmem:[%s836_s3] sm:$0xff]   ;;  %s413_s10 = scalar_lea.sflag [#allocation3], %s213_s16 }
  0x17   : > { %v221_v3 = vld [vmem:[%s219_s13] sm:$0xff]  ;;  %529 = vmatpush3.bf16.msra.mxu1 %v591_v5  ;;  %p602_p11 = scmp.ne.s32.totalorder %s793_s6, %s601_s22  ;;  %s607_s13 = scalar_lea.vmem %s606_s12, 256 }
  0x18   : > { %v222_v4 = vpack.c.bf16 %v221_v3, %v221_v3  ;;  %530 = vmatprep.subr.bf16.mxu1 %v663_v1  ;;  %v491_v13 = vld [vmem:[%s835_s2] ss:$0 sm:$0xff]  ;;  %p609_p1 = scmp.lt.s32.totalorder %s607_s13, %s601_s22 }
  0x19   : > { %523 = vmatpush3.bf16.msra.mxu0 %v590_v2  ;;  %v495_v29 = vld [vmem:[%s837_s4] ss:$0 sm:$0xff]  ;;  %p603_p12 = pnand %p602_p11, %p734_p5 }
  0x1a   : > { %p610_p2 = por %p609_p1, %p608_p0 }
  0x1b   : > { %531 = vmatpush3.bf16.msra.mxu1 %v592_v6  ;;  %p604_p13 = pneg %p603_p12 }
  0x1c   : > { %525 = vmatmul.mubr.msk.bf16.vlgmr.msra.gmra.mxu0 %vm246_vm1, %v222_v4  ;;  %532 = vmatprep.subr.bf16.mxu1 %v663_v1 }
  0x1d   : > { %p611_p3 = pnand %p610_p2, %p604_p13 }
  0x1f   : > { %533 = vmatpush3.bf16.msra.mxu1 %v593_v7 }
  0x20   : > { %534 = vmatprep.subr.bf16.mxu1 %v663_v1 }
  0x23   : > { %535 = vmatpush3.bf16.msra.mxu1 %v594_v8 }
  0x24   : > { %536 = vmatprep.subr.bf16.mxu1 %v663_v1 }
  0x27   : > { %537 = vmatpush3.bf16.msra.mxu1 %v595_v9 }
  0x28   : > { %538 = vmatprep.subr.bf16.mxu1 %v663_v1 }
  0x2b   : > { %539 = vmatpush3.bf16.msra.mxu1 %v596_v10 }
  0x2c   : > { %540 = vmatprep.subr.bf16.mxu1 %v663_v1 }
  0x2f   : > { %541 = vmatpush3.bf16.msra.mxu1 %v597_v11 }
  0x30   : > { %542 = vmatprep.subr.bf16.mxu1 %v663_v1 }
  0x33   : > { %543 = vmatpush3.bf16.msra.mxu1 %v598_v12 }
  0xdc   : > { %v284_v14 = vpop.f32.mrf.mxu0 }
  0xdd   : > { %v285_v15 = vadd.f32 %v491_v13, %v284_v14 }
  0xde   : > { %v526_v16 = vpop.f32.mrf.mxu0 }
  0xdf   : > { %v291_v17 = vmul.f32 0.044715, %v285_v15  ;;  %v290_v25 = vmul.f32 0.5, %v285_v15 }
  0xe0   : > { %v287_v18 = vpop.f32.mrf.mxu0 }
  0xe1   : > { %v292_v19 = vmul.f32 %v291_v17, %v285_v15 }
  0xe2   : > { %v527_v20 = vpop.f32.mrf.mxu0 }
  0xe3   : > { %v293_v21 = vmul.f32 %v292_v19, %v285_v15 }
  0xe5   : > { %v294_v22 = vadd.f32 %v293_v21, %v285_v15 }
  0xe7   : > { %v295_v23 = vmul.f32 0.7978846, %v294_v22 }
  0xe9   : > { %599 = vtanh.f32 %v295_v23 }
  0xf6   : > { %v600_v24 = vpop.eup %599 }
  0xf7   : > { %v297_v26 = vadd.f32 1.0, %v600_v24 }
  0xf9   : > { %v298_v27 = vmul.f32 %v297_v26, %v290_v25 }
  0xfb   : > { %v299_v28 = vpack.c.bf16 %v298_v27, %v298_v27 }
  0xfd   : > { %545 = vmatmul.mubr.bf16.vlgmr.msra.gmra.mxu1 %v299_v28 }
 0x1bd   : > { %v405_v30 = vpop.f32.mrf.mxu1 }
 0x1be   : > { %v406_v31 = vadd.f32 %v495_v29, %v405_v30 }
 0x1bf   : > { %v546_v32 = vpop.f32.mrf.mxu1 }
 0x1c0   : > { %411 = vst.msk [vmem:[%s215_s30] sm:$0xff] %vm246_vm1, %v406_v31 }
 0x1c1   : > { %v408_v33 = vpop.f32.mrf.mxu1 }
 0x1c2   : > { %614 = shalt.err (!%p611_p3)
}
 0x1c3   : > { %s615_s14 = scalar_lea.hbm %s791_s9, 128  ;;  %s619_s17 = scalar_lea.hbm %s838_s5, 256 }
 0x1c4   : > { %p616_p4 = scmp.ne.s32.totalorder %s791_s9, %s615_s14  ;;  %p620_p9 = scmp.lt.s32.totalorder %s791_s9, %s838_s5 }
 0x1c5   : > { %p621_p10 = scmp.lt.s32.totalorder %s619_s17, %s615_s14 }
 0x1c6   : > { %p617_p7 = pnand %p616_p4, %p734_p5 }
 0x1c7   : > { %p622_p11 = por %p621_p10, %p620_p9 }
 0x1c8   : > { %p618_p8 = pneg %p617_p7 }
 0x1ca   : > { %p623_p12 = pnand %p622_p11, %p618_p8 }
 0x1cc   : > { %626 = shalt.err (!%p623_p12)
}
 0x1cd   : > { %548 = dma.vmem_to_hbm [thread:$0]  (%p734_p5), %s793_s6, 128, %s791_s9, %s413_s10   ;;  %v547_v34 = vpop.f32.mrf.mxu1 }
 0x1ce PF: > { %p554_p13 = scmp.ge.s32.totalorder %s661_s21, 2  ;;  %s438_s26 = sand.u32 1, %s649_s18  }
 0x1cf   : > { %s439_s30 = scalar_lea.sflag [#allocation3], %s438_s26 }
 0x1d0   : > { %p551_p0 = pnand %p554_p13, %p738_p6 }
 0x1d2   : > { %p552_p1 = pneg %p551_p0 }
 0x1d4   : > { %644 = dma.done.wait (%p552_p1), %s439_s30, 128  }
 0x1d5   : > { %646 = vsyncadd (%p552_p1), %s439_s30, 4294967168  ;;  %p15_p2 = scmp.ge.s32.totalorder %s721_s24, 4   ;;  %s841_s18 = smov %s653_s19 }
 0x1d6   : > { %s842_s19 = smov %s657_s20  ;;  %s843_s20 = smov %s732_s27 }
 0x1d7   : > { %s844_s21 = smov %s721_s24  ;;  %17 = sbr.rel (!%p15_p2) target bundleno = 3 (0x3), region = 75 }
 0x1dc   :  { %444 = vsyncpa [#allocation3], 1 }
 0x1dd   :  { %446 = vsyncpa [#allocation3 + $0x1], 1 }

</bundles_post_ra>
